<compile_context>
chip_gen: v7x
topology: tpu7x:2x2x1
jax: 0.10.0
libtpu: 0.0.40
codegen_flags: <defaults>
</compile_context>

<pallas_src>
import functools
import math

import jax
import jax.numpy as jnp
from jax.experimental import pallas as pl
from jax.experimental.pallas import tpu as pltpu

EPS = 1e-3  # matches nn.BatchNorm2d(out_channels, eps=0.001)


def _conv_relu(patches_ref, w_ref, b_ref):
    # (C_out, K) @ (K, TM) on the MXU, f32 accumulation, + bias, ReLU.
    y = jnp.dot(w_ref[...], patches_ref[...], preferred_element_type=jnp.float32)
    return jnp.maximum(y + b_ref[...], 0.0)


def _stats_kernel(patches_ref, w_ref, b_ref, g_ref, be_ref, scale_ref, shift_ref,
                  *, inv_m, m_valid, tile_m, needs_mask):
    """Phase 1: single-pass per-channel sum / sum-of-squares over all tiles;
    last tile folds mean/var/gamma/beta into per-channel (scale, shift)."""
    i = pl.program_id(0)

    @pl.when(i == 0)
    def _():
        scale_ref[...] = jnp.zeros_like(scale_ref)
        shift_ref[...] = jnp.zeros_like(shift_ref)

    y = _conv_relu(patches_ref, w_ref, b_ref)                       # (C_out, TM)
    if needs_mask:
        col = jax.lax.broadcasted_iota(jnp.int32, (1, tile_m), 1) + i * tile_m
        y = jnp.where(col < m_valid, y, 0.0)                        # drop padded cols

    scale_ref[...] = scale_ref[...] + jnp.sum(y, axis=1, keepdims=True)      # sum
    shift_ref[...] = shift_ref[...] + jnp.sum(y * y, axis=1, keepdims=True)  # sumsq

    @pl.when(i == pl.num_programs(0) - 1)
    def _():
        mean = scale_ref[...] * inv_m
        var = shift_ref[...] * inv_m - mean * mean                  # biased variance
        inv = jax.lax.rsqrt(var + EPS)
        scale = g_ref[...] * inv
        scale_ref[...] = scale
        shift_ref[...] = be_ref[...] - mean * scale


def _norm_kernel(patches_ref, w_ref, b_ref, scale_ref, shift_ref, out_ref):
    """Phase 2: recompute the cheap K=9 conv+ReLU, apply folded BN affine,
    write an unpadded, lane-dense (C_out, TM) block directly in NCHW order."""
    y = _conv_relu(patches_ref, w_ref, b_ref)
    out_ref[...] = y * scale_ref[...] + shift_ref[...]


def _largest_128_divisor(total, cap):
    """Largest multiple of 128 that divides `total` and is <= cap, else None."""
    best = None
    t = 128
    top = min(cap, total)
    while t <= top:
        if total % t == 0:
            best = t
        t += 128
    return best


def _vmem_limit(bytes_needed):
    # Generous headroom, but stay well under v7x's 64 MiB physical VMEM.
    return int(min(48 << 20, max(16 << 20, 2 * bytes_needed)))


def cnn_relu_batchnorm(x_nchw, weight, bias, gamma, beta, *,
                       stats_tile=32768, norm_tile=8192):
    """x_nchw: (N, C_in, H, W); weight: (C_out, C_in, 3, 3) OIHW. Returns NCHW."""
    N, C_in, H, W = x_nchw.shape
    C_out = weight.shape[0]
    K = C_in * 9
    HW = H * W
    M = N * HW

    assert C_out % 8 == 0, "C_out must be a multiple of 8 (sublane tiling)"
    # Phase 2 writes directly into NCHW, so H*W must tile by a multiple of 128.
    # TODO(synk): masked-tail path for spatial sizes with H*W % 128 != 0.
    tm2 = _largest_128_divisor(HW, norm_tile)
    assert tm2 is not None, f"H*W={HW} needs a multiple-of-128 divisor <= {norm_tile}"
    blocks_per_image = HW // tm2

    # Phase-1 tile over flat M (decoupled from phase 2); pad + mask if awkward.
    tm1 = _largest_128_divisor(M, stats_tile)
    if tm1 is None:
        tm1 = max(128, (min(stats_tile, M) // 128) * 128)
    mp = math.ceil(M / tm1) * tm1
    needs_mask = mp != M

    # ---- glue: im2col, K-major (K, M) so the kernel RHS is lane-dense ----
    # TODO(synk): fuse im2col into the kernel to drop this materialized stream.
    x_nhwc = jnp.transpose(x_nchw, (0, 2, 3, 1)).astype(jnp.float32)
    xp = jnp.pad(x_nhwc, ((0, 0), (1, 1), (1, 1), (0, 0)))            # padding=1
    taps = jnp.stack(
        [xp[:, i:i + H, j:j + W, :] for i in range(3) for j in range(3)], axis=0
    )                                                                  # (9, N, H, W, C_in)
    patches = jnp.transpose(taps, (4, 0, 1, 2, 3)).reshape(K, M)       # k = ci*9 + kh*3 + kw
    if mp != M:
        patches = jnp.pad(patches, ((0, 0), (0, mp - M)))

    w2d = weight.reshape(C_out, K).astype(jnp.float32)                 # (C_out, K), OIHW order
    b2d = bias.astype(jnp.float32).reshape(C_out, 1)
    g2d = gamma.astype(jnp.float32).reshape(C_out, 1)
    be2d = beta.astype(jnp.float32).reshape(C_out, 1)

    # ---- phase 1: per-channel (scale, shift), sequential accumulation ----
    p1_patch = pl.BlockSpec((K, tm1), lambda i: (0, i))
    p1_w = pl.BlockSpec((C_out, K), lambda i: (0, 0))
    p1_col = pl.BlockSpec((C_out, 1), lambda i: (0, 0))

    f32 = 4
    p1_need = f32 * (2 * K * tm1 + 2 * (C_out * K + 3 * C_out) + 4 * C_out * tm1)
    flops1 = 2 * mp * K * C_out + 5 * mp * C_out
    bytes1 = f32 * (mp * K + C_out * K + 5 * C_out)

    scale, shift = pl.pallas_call(
        functools.partial(_stats_kernel, inv_m=1.0 / M, m_valid=M, tile_m=tm1,
                          needs_mask=needs_mask),
        out_shape=(jax.ShapeDtypeStruct((C_out, 1), jnp.float32),
                   jax.ShapeDtypeStruct((C_out, 1), jnp.float32)),
        grid=(mp // tm1,),
        in_specs=[p1_patch, p1_w, p1_col, p1_col, p1_col],
        out_specs=(p1_col, p1_col),
        compiler_params=pltpu.CompilerParams(
            dimension_semantics=("arbitrary",),
            vmem_limit_bytes=_vmem_limit(p1_need)),
        cost_estimate=pl.CostEstimate(flops=flops1, transcendentals=C_out,
                                      bytes_accessed=bytes1),
    )(patches, w2d, b2d, g2d, be2d)

    # ---- phase 2: recompute conv+ReLU, fused scale/shift, direct NCHW write ----
    p2_patch = pl.BlockSpec((K, tm2),
                            lambda n, t: (0, n * blocks_per_image + t))
    p2_w = pl.BlockSpec((C_out, K), lambda n, t: (0, 0))
    p2_col = pl.BlockSpec((C_out, 1), lambda n, t: (0, 0))
    p2_out = pl.BlockSpec((C_out, tm2), lambda n, t: (n, t))

    p2_need = f32 * (2 * K * tm2 + 2 * C_out * tm2 + 2 * C_out * tm2
                     + 2 * (C_out * K + 3 * C_out))
    flops2 = 2 * M * K * C_out + 4 * M * C_out
    bytes2 = f32 * (M * K + C_out * K + 4 * C_out + M * C_out)

    out2d = pl.pallas_call(
        _norm_kernel,
        out_shape=jax.ShapeDtypeStruct((N * C_out, HW), jnp.float32),
        grid=(N, blocks_per_image),
        in_specs=[p2_patch, p2_w, p2_col, p2_col, p2_col],
        out_specs=p2_out,
        compiler_params=pltpu.CompilerParams(
            dimension_semantics=("parallel", "parallel"),
            vmem_limit_bytes=_vmem_limit(p2_need)),
        cost_estimate=pl.CostEstimate(flops=flops2, transcendentals=0,
                                      bytes_accessed=bytes2),
    )(patches, w2d, b2d, scale, shift)

    # (N*C_out, HW) row-major is exactly NCHW memory order: this reshape is free.
    return out2d.reshape(N, C_out, H, W)


def reference(x_nchw, weight, bias, gamma, beta):
    """Pure-JAX reference matching the PyTorch module's forward (training mode)."""
    y = jax.lax.conv_general_dilated(
        x_nchw.astype(jnp.float32), weight.astype(jnp.float32),
        window_strides=(1, 1), padding=((1, 1), (1, 1)),
        dimension_numbers=("NCHW", "OIHW", "NCHW"),
    )
    y = y + bias[None, :, None, None]
    y = jnp.maximum(y, 0.0)
    mean = y.mean(axis=(0, 2, 3), keepdims=True)
    var = ((y - mean) ** 2).mean(axis=(0, 2, 3), keepdims=True)
    return (y - mean) / jnp.sqrt(var + EPS) * gamma[None, :, None, None] \
        + beta[None, :, None, None]


if __name__ == "__main__":
    # shapes consistent with the module defaults: in_channels=1, out_channels=64
    N, C_in, H, W = 2, 1, 16, 16
    C_out = 64

    key = jax.random.PRNGKey(0)
    kx, kw, kb, kg, kbe = jax.random.split(key, 5)

    x = jax.random.normal(kx, (N, C_in, H, W), dtype=jnp.float32)
    fan_in = C_in * 3 * 3
    bound = 1.0 / (fan_in ** 0.5)
    weight = jax.random.uniform(kw, (C_out, C_in, 3, 3), minval=-bound, maxval=bound)
    bias = jax.random.uniform(kb, (C_out,), minval=-bound, maxval=bound)
    gamma = jnp.ones((C_out,), jnp.float32) + 0.05 * jax.random.normal(kg, (C_out,))
    beta = 0.05 * jax.random.normal(kbe, (C_out,))

    # Small tile caps so the test exercises multi-tile paths:
    #   phase 1 grid=(2,) (cross-tile BN statistics), phase 2 grid=(2, 2)
    #   (per-image, per-spatial-tile NCHW writes).
    out = cnn_relu_batchnorm(x, weight, bias, gamma, beta,
                             stats_tile=256, norm_tile=128)
    out = jax.block_until_ready(out)

    ref = jax.block_until_ready(reference(x, weight, bias, gamma, beta))
    assert out.shape == (N, C_out, H, W), out.shape
    err = float(jnp.max(jnp.abs(out - ref)))
    assert jnp.allclose(out, ref, atol=1e-4, rtol=1e-4), err

    print("KERNEL_OK")
</pallas_src>

<mosaic_0001>
module attributes {stable_mosaic.version = 11 : i64} {
  func.func @_stats_kernel(%arg0: i32, %arg1: memref<9x256xf32, #tpu.memory_space<vmem>>, %arg2: memref<64x9xf32, #tpu.memory_space<vmem>>, %arg3: memref<64x1xf32, #tpu.memory_space<vmem>>, %arg4: memref<64x1xf32, #tpu.memory_space<vmem>>, %arg5: memref<64x1xf32, #tpu.memory_space<vmem>>, %arg6: memref<64x1xf32, #tpu.memory_space<vmem>>, %arg7: memref<64x1xf32, #tpu.memory_space<vmem>>) attributes {dimension_semantics = [#tpu.dimension_semantics<arbitrary>], iteration_bounds = array<i64: 2>, scalar_prefetch = 0 : i64, scratch_operands = 0 : i64, tpu.core_type = #tpu.core_type<tc>, window_params = [{transform_indices = @transform_0, window_bounds = array<i64: 9, 256>}, {pipeline_mode = #tpu.pipeline_mode<synchronous>, transform_indices = @transform_1, window_bounds = array<i64: 64, 9>}, {pipeline_mode = #tpu.pipeline_mode<synchronous>, transform_indices = @transform_2, window_bounds = array<i64: 64, 1>}, {pipeline_mode = #tpu.pipeline_mode<synchronous>, transform_indices = @transform_3, window_bounds = array<i64: 64, 1>}, {pipeline_mode = #tpu.pipeline_mode<synchronous>, transform_indices = @transform_4, window_bounds = array<i64: 64, 1>}, {pipeline_mode = #tpu.pipeline_mode<synchronous>, transform_indices = @transform_5, window_bounds = array<i64: 64, 1>}, {pipeline_mode = #tpu.pipeline_mode<synchronous>, transform_indices = @transform_6, window_bounds = array<i64: 64, 1>}]} {
    %c0_i32 = arith.constant 0 : i32
    %0 = arith.cmpi eq, %arg0, %c0_i32 : i32
    %1 = arith.extui %0 : i1 to i32
    %c0_i32_0 = arith.constant 0 : i32
    %2 = arith.cmpi ne, %1, %c0_i32_0 : i32
    scf.if %2 {
      %cst_18 = arith.constant 0.000000e+00 : f32
      %25 = vector.broadcast %cst_18 : f32 to vector<64x1xf32>
      %c0_19 = arith.constant 0 : index
      %c0_20 = arith.constant 0 : index
      %26 = vector.load %arg6[%c0_19, %c0_20] : memref<64x1xf32, #tpu.memory_space<vmem>>, vector<64x1xf32>
      tpu.vector_store %arg6[%c0_19, %c0_20], %25 {strides = array<i32>} : memref<64x1xf32, #tpu.memory_space<vmem>>, vector<64x1xf32>,
      %cst_21 = arith.constant 0.000000e+00 : f32
      %27 = vector.broadcast %cst_21 : f32 to vector<64x1xf32>
      %c0_22 = arith.constant 0 : index
      %c0_23 = arith.constant 0 : index
      %28 = vector.load %arg7[%c0_22, %c0_23] : memref<64x1xf32, #tpu.memory_space<vmem>>, vector<64x1xf32>
      tpu.vector_store %arg7[%c0_22, %c0_23], %27 {strides = array<i32>} : memref<64x1xf32, #tpu.memory_space<vmem>>, vector<64x1xf32>,
    } else {
    }
    %c0 = arith.constant 0 : index
    %c0_1 = arith.constant 0 : index
    %3 = vector.load %arg2[%c0, %c0_1] : memref<64x9xf32, #tpu.memory_space<vmem>>, vector<64x9xf32>
    %c0_2 = arith.constant 0 : index
    %c0_3 = arith.constant 0 : index
    %4 = vector.load %arg1[%c0_2, %c0_3] : memref<9x256xf32, #tpu.memory_space<vmem>>, vector<9x256xf32>
    %cst = arith.constant dense<0.000000e+00> : vector<64x256xf32>
    %5 = tpu.matmul %3, %4, %cst {dimension_numbers = #tpu.dot_dimension_numbers<[1], [0], [0], [1], [0, 0, 1, 1], [], []>} : vector<64x9xf32>, vector<9x256xf32>, vector<64x256xf32> -> vector<64x256xf32>
    %c0_4 = arith.constant 0 : index
    %c0_5 = arith.constant 0 : index
    %6 = vector.load %arg3[%c0_4, %c0_5] : memref<64x1xf32, #tpu.memory_space<vmem>>, vector<64x1xf32>
    %7 = vector.broadcast %6 : vector<64x1xf32> to vector<64x256xf32>
    %8 = arith.addf %5, %7 : vector<64x256xf32>
    %cst_6 = arith.constant 0.000000e+00 : f32
    %9 = vector.broadcast %cst_6 : f32 to vector<64x256xf32>
    %10 = arith.maximumf %8, %9 : vector<64x256xf32>
    %c0_7 = arith.constant 0 : index
    %c0_8 = arith.constant 0 : index
    %11 = vector.load %arg6[%c0_7, %c0_8] : memref<64x1xf32, #tpu.memory_space<vmem>>, vector<64x1xf32>
    %cst_9 = arith.constant dense<0.000000e+00> : vector<64xf32>
    %12 = vector.multi_reduction <add>, %10, %cst_9 [1] : vector<64x256xf32> to vector<64xf32>
    %13 = vector.shape_cast %12 : vector<64xf32> to vector<64x1xf32>
    %14 = arith.addf %11, %13 : vector<64x1xf32>
    %c0_10 = arith.constant 0 : index
    %c0_11 = arith.constant 0 : index
    %15 = vector.load %arg6[%c0_10, %c0_11] : memref<64x1xf32, #tpu.memory_space<vmem>>, vector<64x1xf32>
    tpu.vector_store %arg6[%c0_10, %c0_11], %14 {strides = array<i32>} : memref<64x1xf32, #tpu.memory_space<vmem>>, vector<64x1xf32>,
    %c0_12 = arith.constant 0 : index
    %c0_13 = arith.constant 0 : index
    %16 = vector.load %arg7[%c0_12, %c0_13] : memref<64x1xf32, #tpu.memory_space<vmem>>, vector<64x1xf32>
    %17 = arith.mulf %10, %10 : vector<64x256xf32>
    %cst_14 = arith.constant dense<0.000000e+00> : vector<64xf32>
    %18 = vector.multi_reduction <add>, %17, %cst_14 [1] : vector<64x256xf32> to vector<64xf32>
    %19 = vector.shape_cast %18 : vector<64xf32> to vector<64x1xf32>
    %20 = arith.addf %16, %19 : vector<64x1xf32>
    %c0_15 = arith.constant 0 : index
    %c0_16 = arith.constant 0 : index
    %21 = vector.load %arg7[%c0_15, %c0_16] : memref<64x1xf32, #tpu.memory_space<vmem>>, vector<64x1xf32>
    tpu.vector_store %arg7[%c0_15, %c0_16], %20 {strides = array<i32>} : memref<64x1xf32, #tpu.memory_space<vmem>>, vector<64x1xf32>,
    %c1_i32 = arith.constant 1 : i32
    %22 = arith.cmpi eq, %arg0, %c1_i32 : i32
    %23 = arith.extui %22 : i1 to i32
    %c0_i32_17 = arith.constant 0 : i32
    %24 = arith.cmpi ne, %23, %c0_i32_17 : i32
    scf.if %24 {
      %c0_18 = arith.constant 0 : index
      %c0_19 = arith.constant 0 : index
      %25 = vector.load %arg6[%c0_18, %c0_19] : memref<64x1xf32, #tpu.memory_space<vmem>>, vector<64x1xf32>
      %cst_20 = arith.constant 0.001953125 : f32
      %26 = vector.broadcast %cst_20 : f32 to vector<64x1xf32>
      %27 = arith.mulf %25, %26 : vector<64x1xf32>
      %c0_21 = arith.constant 0 : index
      %c0_22 = arith.constant 0 : index
      %28 = vector.load %arg7[%c0_21, %c0_22] : memref<64x1xf32, #tpu.memory_space<vmem>>, vector<64x1xf32>
      %cst_23 = arith.constant 0.001953125 : f32
      %29 = vector.broadcast %cst_23 : f32 to vector<64x1xf32>
      %30 = arith.mulf %28, %29 : vector<64x1xf32>
      %31 = arith.mulf %27, %27 : vector<64x1xf32>
      %32 = arith.subf %30, %31 : vector<64x1xf32>
      %cst_24 = arith.constant 1.000000e-03 : f32
      %33 = vector.broadcast %cst_24 : f32 to vector<64x1xf32>
      %34 = arith.addf %32, %33 : vector<64x1xf32>
      %35 = math.rsqrt %34 : vector<64x1xf32>
      %c0_25 = arith.constant 0 : index
      %c0_26 = arith.constant 0 : index
      %36 = vector.load %arg4[%c0_25, %c0_26] : memref<64x1xf32, #tpu.memory_space<vmem>>, vector<64x1xf32>
      %37 = arith.mulf %36, %35 : vector<64x1xf32>
      %c0_27 = arith.constant 0 : index
      %c0_28 = arith.constant 0 : index
      %38 = vector.load %arg6[%c0_27, %c0_28] : memref<64x1xf32, #tpu.memory_space<vmem>>, vector<64x1xf32>
      tpu.vector_store %arg6[%c0_27, %c0_28], %37 {strides = array<i32>} : memref<64x1xf32, #tpu.memory_space<vmem>>, vector<64x1xf32>,
      %c0_29 = arith.constant 0 : index
      %c0_30 = arith.constant 0 : index
      %39 = vector.load %arg5[%c0_29, %c0_30] : memref<64x1xf32, #tpu.memory_space<vmem>>, vector<64x1xf32>
      %40 = arith.mulf %27, %37 : vector<64x1xf32>
      %41 = arith.subf %39, %40 : vector<64x1xf32>
      %c0_31 = arith.constant 0 : index
      %c0_32 = arith.constant 0 : index
      %42 = vector.load %arg7[%c0_31, %c0_32] : memref<64x1xf32, #tpu.memory_space<vmem>>, vector<64x1xf32>
      tpu.vector_store %arg7[%c0_31, %c0_32], %41 {strides = array<i32>} : memref<64x1xf32, #tpu.memory_space<vmem>>, vector<64x1xf32>,
    } else {
    }
    return
  }
  func.func @transform_0(%arg0: i32) -> (i32, i32) {
    %c0_i32 = arith.constant 0 : i32
    %c0_i32_0 = arith.constant 0 : i32
    return %c0_i32, %arg0 : i32, i32
  }
  func.func @transform_1(%arg0: i32) -> (i32, i32) {
    %c0_i32 = arith.constant 0 : i32
    %c0_i32_0 = arith.constant 0 : i32
    %c0_i32_1 = arith.constant 0 : i32
    return %c0_i32, %c0_i32_0 : i32, i32
  }
  func.func @transform_2(%arg0: i32) -> (i32, i32) {
    %c0_i32 = arith.constant 0 : i32
    %c0_i32_0 = arith.constant 0 : i32
    %c0_i32_1 = arith.constant 0 : i32
    return %c0_i32, %c0_i32_0 : i32, i32
  }
  func.func @transform_3(%arg0: i32) -> (i32, i32) {
    %c0_i32 = arith.constant 0 : i32
    %c0_i32_0 = arith.constant 0 : i32
    %c0_i32_1 = arith.constant 0 : i32
    return %c0_i32, %c0_i32_0 : i32, i32
  }
  func.func @transform_4(%arg0: i32) -> (i32, i32) {
    %c0_i32 = arith.constant 0 : i32
    %c0_i32_0 = arith.constant 0 : i32
    %c0_i32_1 = arith.constant 0 : i32
    return %c0_i32, %c0_i32_0 : i32, i32
  }
  func.func @transform_5(%arg0: i32) -> (i32, i32) {
    %c0_i32 = arith.constant 0 : i32
    %c0_i32_0 = arith.constant 0 : i32
    %c0_i32_1 = arith.constant 0 : i32
    return %c0_i32, %c0_i32_0 : i32, i32
  }
  func.func @transform_6(%arg0: i32) -> (i32, i32) {
    %c0_i32 = arith.constant 0 : i32
    %c0_i32_0 = arith.constant 0 : i32
    %c0_i32_1 = arith.constant 0 : i32
    return %c0_i32, %c0_i32_0 : i32, i32
  }
}

</mosaic_0001>

<bundles_post_ra>
// kernel: tpu_custom_call.1
= control target key start
LH: loop header
LB: loop body
LE: loop exit
PB: predicated region body
PF: predicated region fallthrough
CT: control target
= control target key end

     0   :  { %s921_s21 = smov 0   ;;  %s923_s22 = smov 0   ;;  %s1408_s0 = inlined_call_operand.vmem [shape: f32[9,512], index: 0, kind: input, shape index: {}]   ;;  %s1409_s1 = inlined_call_operand.vmem [shape: f32[64,9], index: 1, kind: input, shape index: {}]   ;;  %s1410_s2 = inlined_call_operand.vmem [shape: f32[64,1], index: 2, kind: input, shape index: {}]   ;;  %s1411_s3 = inlined_call_operand.vmem [shape: f32[64,1], index: 3, kind: input, shape index: {}]   ;;  %s1412_s4 = inlined_call_operand.vmem [shape: f32[64,1], index: 4, kind: input, shape index: {}]   ;;  %s1413_s5 = inlined_call_operand.vmem [shape: f32[64,1], index: 5, kind: output, shape index: {0}]   ;;  %s1414_s6 = inlined_call_operand.vmem [shape: f32[64,1], index: 6, kind: output, shape index: {1}]  }
   0x1   :  { %s925_s23 = smov 0  }
   0x2 LB: > { %s781_s24 = sadd.s32 4294967295, %s880_s23   ;;  %s938_s25 = sadd.s32 1, %s880_s23   ;;  %s880_s23 = sphi %s925_s23, %s1417_s23   ;;  %s876_s22 = sphi %s923_s22, %s1416_s22   ;;  %s872_s21 = sphi %s921_s21, %s1415_s21  }
   0x3   : > { %s21_s26 = ssub.s32 %s880_s23, %s938_s25  ;;  %s24_s27 = sadd.s32 1, %s876_s22 }
   0x4   : > { %p22_p0 = scmp.eq.s32.totalorder %s21_s26, 0  ;;  %p31_p1 = scmp.ne.s32.totalorder %s876_s22, %s872_s21 }
   0x5   : > { %p32_p2 = scmp.eq.s32.totalorder %s880_s23, 0  ;;  %p783_p4 = scmp.ge.s32.totalorder %s880_s23, 2 }
   0x6   : > { %s947_s28 = scalar_select %p22_p0, %s876_s22, %s24_s27  }
   0x7   : > { %p33_p3 = por %p32_p2, %p31_p1  ;;  %195 = sbr.rel (%p783_p4) target bundleno = 21 (0x15), region = 32 }
   0xe   : > { %198 = sbr.rel (!%p33_p3) target bundleno = 21 (0x15), region = 36  ;;  %s200_s29 = sand.u32 (%p33_p3), 1, %s876_s22  }
   0xf   : > { %s803_s30 = sshll.u32 (%p33_p3), %s880_s23, 4  ;;  %s784_s7 = sshll.u32 (%p33_p3), %s200_s29, 5 }
  0x10   : > { %s205_s10 = scalar_lea.vmem (%p33_p3), %s1408_s0, %s803_s30  ;;  %s202_s11 = scalar_lea.vmem (%p33_p3), [#allocation2], %s784_s7 }
  0x11   : > { %v218_v0 = vld [vmem:[%s205_s10] sm:$0xff] (%p33_p3)  ;;  %v220_v1 = vld [vmem:[%s205_s10 + $0x8] sm:$0xff] (%p33_p3) }
  0x12   : > { %v222_v2 = vld [vmem:[%s205_s10 + $0x20] sm:$0xff] (%p33_p3)  ;;  %219 = vst [vmem:[%s202_s11] sm:$0xff] (%p33_p3), %v218_v0  ;;  %221 = vst [vmem:[%s202_s11 + $0x8] sm:$0xff] (%p33_p3), %v220_v1  ;;  %v224_v3 = vld [vmem:[%s205_s10 + $0x28] sm:$0xff] (%p33_p3) }
  0x13   : > { %223 = vst [vmem:[%s202_s11 + $0x10] sm:$0xff] (%p33_p3), %v222_v2  ;;  %225 = vst [vmem:[%s202_s11 + $0x18] sm:$0xff] (%p33_p3), %v224_v3 }
  0x15 PF: > { %p787_p5 = scmp.ge.s32.totalorder %s880_s23, 1  ;;  %p230_p6 = scmp.lt.s32.totalorder %s880_s23, 3 }
  0x17   : > { %p231_p7 = pnand %p787_p5, %p230_p6 }
  0x18   : > { %s237_s12 = sand.u32 (!%p231_p7), 1, %s872_s21   ;;  %p789_p8 = scmp.ne.s32.totalorder (!%p231_p7), %s781_s24, 0 }
  0x19   : > { %234 = sbr.rel (%p231_p7) target bundleno = 477 (0x1dd), region = 59  ;;  %s788_s13 = sshll.u32 (!%p231_p7), %s237_s12, 5 }
  0x1a   : > { %s239_s14 = scalar_lea.vmem (!%p231_p7), [#allocation2], %s788_s13 }
  0x20   : > { %265 = sbr.rel (%p789_p8) target bundleno = 41 (0x29), region = 67  ;;  %vm266_vm0 = vcmask (!%p789_p8), 7168   ;;  %v882_v4 = vmov (!%p789_p8), 0.0  }
  0x21   : > { %267 = vst.msk [vmem:[%s1413_s5] sm:$0xff] (!%p789_p8), %vm266_vm0, %v882_v4  ;;  %268 = vst.msk [vmem:[%s1413_s5 + $0x8] sm:$0xff] (!%p789_p8), %vm266_vm0, %v882_v4 }
  0x22   : > { %269 = vst.msk [vmem:[%s1413_s5 + $0x10] sm:$0xff] (!%p789_p8), %vm266_vm0, %v882_v4  ;;  %270 = vst.msk [vmem:[%s1413_s5 + $0x18] sm:$0xff] (!%p789_p8), %vm266_vm0, %v882_v4 }
  0x23   : > { %271 = vst.msk [vmem:[%s1413_s5 + $0x20] sm:$0xff] (!%p789_p8), %vm266_vm0, %v882_v4  ;;  %272 = vst.msk [vmem:[%s1413_s5 + $0x28] sm:$0xff] (!%p789_p8), %vm266_vm0, %v882_v4 }
  0x24   : > { %273 = vst.msk [vmem:[%s1413_s5 + $0x30] sm:$0xff] (!%p789_p8), %vm266_vm0, %v882_v4  ;;  %274 = vst.msk [vmem:[%s1413_s5 + $0x38] sm:$0xff] (!%p789_p8), %vm266_vm0, %v882_v4 }
  0x25   : > { %275 = vst.msk [vmem:[%s1414_s6] sm:$0xff] (!%p789_p8), %vm266_vm0, %v882_v4  ;;  %276 = vst.msk [vmem:[%s1414_s6 + $0x8] sm:$0xff] (!%p789_p8), %vm266_vm0, %v882_v4 }
  0x26   : > { %277 = vst.msk [vmem:[%s1414_s6 + $0x10] sm:$0xff] (!%p789_p8), %vm266_vm0, %v882_v4  ;;  %278 = vst.msk [vmem:[%s1414_s6 + $0x18] sm:$0xff] (!%p789_p8), %vm266_vm0, %v882_v4 }
  0x27   : > { %279 = vst.msk [vmem:[%s1414_s6 + $0x20] sm:$0xff] %vm266_vm0, %v882_v4  ;;  %280 = vst.msk [vmem:[%s1414_s6 + $0x28] sm:$0xff] %vm266_vm0, %v882_v4 }
  0x28   : > { %281 = vst.msk [vmem:[%s1414_s6 + $0x30] sm:$0xff] %vm266_vm0, %v882_v4  ;;  %282 = vst.msk [vmem:[%s1414_s6 + $0x38] sm:$0xff] %vm266_vm0, %v882_v4 }
  0x29 PF: > { %v292_v5 = vld [vmem:[%s239_s14 + $0x8] sm:$0xff]  ;;  %v294_v6 = vld [vmem:[%s239_s14 + $0x18] sm:$0x1]  ;;  %vm368_vm1 = vcmask 1040384   ;;  %v291_v7 = vld [vmem:[%s239_s14] sm:$0xff]  ;;  %vm883_vm2 = vmmov 1  }
  0x2a   : > { %v804_v8 = vpack.c.bf16 %v294_v6, %v292_v5  ;;  %vm805_vm3 = vmpackc.low %vm368_vm1, %vm883_vm2  ;;  %v293_v9 = vld [vmem:[%s239_s14 + $0x10] sm:$0x1]  ;;  %v884_v11 = vmov 0.0   ;;  %v283_v12 = vld [vmem:[%s1409_s1] sm:$0xff]  ;;  %vm343_vm4 = vcmask 72704   ;;  %v885_v15 = vmov 0  }
  0x2b   : > { %v807_v10 = vpack.c.bf16 %v293_v9, %v291_v7  ;;  %439 = vmatprep.mubr.f32.mxu0 %v884_v11  ;;  %463 = vmatprep.mubr.f32.mxu1 %v884_v11  ;;  %v287_v13 = vld [vmem:[%s1409_s1 + $0x20] sm:$0xff]  ;;  %v297_v14 = vld [vmem:[%s1410_s2 + $0x10] sm:$0xff]  ;;  %v298_v17 = vld [vmem:[%s1410_s2 + $0x18] sm:$0xff]  ;;  %vm544_vm5 = vcmask 7168   ;;  %p800_p9 = scmp.ne.s32.totalorder %s781_s24, 1 }
  0x2c   : > { %806 = vmatprep.subr.msk.bf16.mxu0 %vm805_vm3, %v804_v8  ;;  %810 = vmatprep.subr.msk.bf16.mxu1 %vm805_vm3, %v804_v8  ;;  %v295_v16 = vld [vmem:[%s1410_s2] sm:$0xff]  ;;  %v296_v18 = vld [vmem:[%s1410_s2 + $0x8] sm:$0xff]  ;;  %v285_v23 = vld [vmem:[%s1409_s1 + $0x10] sm:$0xff] }
  0x2d   : > { %809 = vmatpush1.bf16.msk.msra.mxu0 %vm805_vm3, %v807_v10  ;;  %811 = vmatpush1.bf16.msk.msra.mxu1 %vm805_vm3, %v807_v10  ;;  %v284_v19 = vld [vmem:[%s1409_s1 + $0x8] sm:$0xff]  ;;  %v299_v22 = vld [vmem:[%s1410_s2 + $0x20] sm:$0xff]  ;;  %v289_v24 = vld [vmem:[%s1409_s1 + $0x30] sm:$0xff] }
  0x2e   : > { %841 = vset.pattern.permute.xlu1 %v885_v15  ;;  %840 = vset.pattern.permute.xlu0 %v885_v15  ;;  %v288_v20 = vld [vmem:[%s1409_s1 + $0x28] sm:$0xff]  ;;  %v302_v25 = vld [vmem:[%s1410_s2 + $0x38] sm:$0xff]  ;;  %v301_v26 = vld [vmem:[%s1410_s2 + $0x30] sm:$0xff] }
  0x2f   : > { %315 = vperm.xlu1 %841, %v297_v14   ;;  %305 = vperm.xlu0 %840, %v295_v16   ;;  %v300_v21 = vld [vmem:[%s1410_s2 + $0x28] sm:$0xff]  ;;  %v286_v27 = vld [vmem:[%s1409_s1 + $0x18] sm:$0xff] }
  0x30   : > { %792 = vmatmul.mubr.msk.f32.vlgmr.msra.gmra.mrb[0].mxu0 %vm343_vm4, %v283_v12  ;;  %796 = vmatmul.mubr.msk.f32.vlgmr.msra.gmra.mrb[0].mxu1 %vm343_vm4, %v287_v13  ;;  %v290_v28 = vld [vmem:[%s1409_s1 + $0x38] sm:$0xff] }
  0x31   : > { %445 = vmatprep.mubr.f32.mxu0 %v884_v11  ;;  %469 = vmatprep.mubr.f32.mxu1 %v884_v11 }
  0x33   : > { %320 = vperm.xlu1 %841, %v298_v17   ;;  %310 = vperm.xlu0 %840, %v296_v18  }
  0x34   : > { %793 = vmatmul.mubr.msk.f32.gmra.mrb[2].mxu0 %vm343_vm4, %v284_v19  ;;  %797 = vmatmul.mubr.msk.f32.gmra.mrb[2].mxu1 %vm343_vm4, %v288_v20 }
  0x35   : > { %451 = vmatprep.mubr.f32.mxu0 %v884_v11  ;;  %475 = vmatprep.mubr.f32.mxu1 %v884_v11 }
  0x37   : > { %330 = vperm.xlu1 %841, %v300_v21   ;;  %325 = vperm.xlu0 %840, %v299_v22  }
  0x38   : > { %794 = vmatmul.mubr.msk.f32.gmra.mrb[4].mxu0 %vm343_vm4, %v285_v23  ;;  %798 = vmatmul.mubr.msk.f32.gmra.mrb[4].mxu1 %vm343_vm4, %v289_v24 }
  0x39   : > { %457 = vmatprep.mubr.f32.mxu0 %v884_v11  ;;  %481 = vmatprep.mubr.f32.mxu1 %v884_v11 }
  0x3b   : > { %340 = vperm.xlu1 %841, %v302_v25   ;;  %335 = vperm.xlu0 %840, %v301_v26  }
  0x3c   : > { %795 = vmatmul.mubr.msk.f32.gmra.mrb[6].mxu0 %vm343_vm4, %v286_v27  ;;  %799 = vmatmul.mubr.msk.f32.gmra.mrb[6].mxu1 %vm343_vm4, %v290_v28 }
  0xae   : > { %v306_v29 = vpop.permute.xlu0 %305  ;;  %v316_v30 = vpop.permute.xlu1 %315 }
  0xb2   : > { %v311_v31 = vpop.permute.xlu0 %310  ;;  %v1080_v32 = vpop.permute.xlu1 %320 }
  0xb6   : > { %v326_v33 = vpop.permute.xlu0 %325  ;;  %v331_v42 = vpop.permute.xlu1 %330 }
  0xba   : > { %v336_v59 = vpop.permute.xlu0 %335  ;;  %v341_v16 = vpop.permute.xlu1 %340 }
 0x103   : > { %v441_v34 = vpop.f32.mrb[0].mxu0  ;;  %v465_v35 = vpop.f32.mrb[0].mxu1 }
 0x104   : > { %v442_v36 = vadd.f32 %v441_v34, %v306_v29  ;;  %v466_v37 = vadd.f32 %v465_v35, %v326_v33  ;;  %v443_v38 = vpop.f32.mrb[1].mxu0  ;;  %v467_v39 = vpop.f32.mrb[1].mxu1 }
 0x105   : > { %v444_v40 = vadd.f32 %v443_v38, %v306_v29  ;;  %v468_v41 = vadd.f32 %v467_v39, %v326_v33 }
 0x106   : > { %v488_v43 = vmax.f32 %v442_v36, 0.0  ;;  %v496_v44 = vmax.f32 %v466_v37, 0.0 }
 0x107   : > { %v489_v45 = vmax.f32 %v444_v40, 0.0  ;;  %v497_v46 = vmax.f32 %v468_v41, 0.0  ;;  %v447_v47 = vpop.f32.mrb[2].mxu0  ;;  %v471_v48 = vpop.f32.mrb[2].mxu1 }
 0x108   : > { %v561_v49 = vmul.f32 %v488_v43, %v488_v43  ;;  %v569_v50 = vmul.f32 %v496_v44, %v496_v44  ;;  %v448_v51 = vadd.f32 %v447_v47, %v311_v31  ;;  %v472_v52 = vadd.f32 %v471_v48, %v331_v42  ;;  %v449_v53 = vpop.f32.mrb[3].mxu0  ;;  %v473_v54 = vpop.f32.mrb[3].mxu1 }
 0x109   : > { %v562_v55 = vmul.f32 %v489_v45, %v489_v45  ;;  %v570_v56 = vmul.f32 %v497_v46, %v497_v46  ;;  %v450_v57 = vadd.f32 %v449_v53, %v311_v31  ;;  %v474_v58 = vadd.f32 %v473_v54, %v331_v42  ;;  %v504_v54 = vld [vmem:[%s1413_s5] sm:$0xff] }
 0x10a   : > { %v490_v60 = vmax.f32 %v448_v51, 0.0  ;;  %v498_v61 = vmax.f32 %v472_v52, 0.0  ;;  %v524_v62 = vadd.f32 %v497_v46, %v496_v44  ;;  %v512_v63 = vadd.f32 %v489_v45, %v488_v43 }
 0x10b   : > { %v491_v0 = vmax.f32 %v450_v57, 0.0  ;;  %v499_v1 = vmax.f32 %v474_v58, 0.0  ;;  %v477_v2 = vpop.f32.mrb[4].mxu1  ;;  %v453_v3 = vpop.f32.mrb[4].mxu0  ;;  %v577_v4 = vadd.f32 %v562_v55, %v561_v49  ;;  %v589_v5 = vadd.f32 %v570_v56, %v569_v50 }
 0x10c   : > { %v563_v6 = vmul.f32 %v490_v60, %v490_v60  ;;  %v571_v7 = vmul.f32 %v498_v61, %v498_v61  ;;  %v478_v8 = vadd.f32 %v477_v2, %v336_v59  ;;  %525 = vadd.xlane.f32.xlu1 %v524_v62  ;;  %v454_v9 = vadd.f32 %v453_v3, %v316_v30  ;;  %v455_v10 = vpop.f32.mrb[5].mxu0  ;;  %v479_v11 = vpop.f32.mrb[5].mxu1  ;;  %v554_v2 = vld [vmem:[%s1414_s6 + $0x8] sm:$0xff] }
 0x10d   : > { %v564_v12 = vmul.f32 %v491_v0, %v491_v0  ;;  %v572_v13 = vmul.f32 %v499_v1, %v499_v1  ;;  %513 = vadd.xlane.f32.xlu0 %v512_v63  ;;  %v456_v14 = vadd.f32 %v455_v10, %v316_v30  ;;  %v480_v15 = vadd.f32 %v479_v11, %v336_v59  ;;  %v553_v59 = vld [vmem:[%s1414_s6] sm:$0xff] }
 0x10e   : > { %v500_v17 = vmax.f32 %v478_v8, 0.0  ;;  %v492_v18 = vmax.f32 %v454_v9, 0.0  ;;  %v527_v19 = vadd.f32 %v499_v1, %v498_v61  ;;  %v515_v20 = vadd.f32 %v491_v0, %v490_v60  ;;  %v509_v60 = vld [vmem:[%s1413_s5 + $0x28] sm:$0xff]  ;;  %v557_v1 = vld [vmem:[%s1414_s6 + $0x20] sm:$0xff] }
 0x10f   : > { %v493_v21 = vmax.f32 %v456_v14, 0.0  ;;  %v501_v22 = vmax.f32 %v480_v15, 0.0  ;;  %v459_v23 = vpop.f32.mrb[6].mxu0  ;;  %v483_v24 = vpop.f32.mrb[6].mxu1  ;;  %v580_v25 = vadd.f32 %v564_v12, %v563_v6  ;;  %v592_v26 = vadd.f32 %v572_v13, %v571_v7  ;;  %v505_v7 = vld [vmem:[%s1413_s5 + $0x8] sm:$0xff]  ;;  %v510_v13 = vld [vmem:[%s1413_s5 + $0x30] sm:$0xff] }
 0x110   : > { %v573_v27 = vmul.f32 %v500_v17, %v500_v17  ;;  %v565_v28 = vmul.f32 %v492_v18, %v492_v18  ;;  %v460_v29 = vadd.f32 %v459_v23, %v1080_v32  ;;  %v484_v31 = vadd.f32 %v483_v24, %v341_v16  ;;  %578 = vadd.xlane.f32.xlu1 %v577_v4  ;;  %v461_v33 = vpop.f32.mrb[7].mxu0  ;;  %v485_v30 = vpop.f32.mrb[7].mxu1  ;;  %v558_v8 = vld [vmem:[%s1414_s6 + $0x28] sm:$0xff]  ;;  %v506_v14 = vld [vmem:[%s1413_s5 + $0x10] sm:$0xff] }
 0x111   : > { %v566_v34 = vmul.f32 %v493_v21, %v493_v21  ;;  %v574_v35 = vmul.f32 %v501_v22, %v501_v22  ;;  %528 = vadd.xlane.f32.xlu0 %v527_v19  ;;  %v462_v36 = vadd.f32 %v461_v33, %v1080_v32  ;;  %v486_v37 = vadd.f32 %v485_v30, %v341_v16  ;;  %v508_v32 = vld [vmem:[%s1413_s5 + $0x20] sm:$0xff]  ;;  %v555_v19 = vld [vmem:[%s1414_s6 + $0x10] sm:$0xff]  ;;  %v556_v33 = vld [vmem:[%s1414_s6 + $0x18] sm:$0xff] }
 0x112   : > { %v494_v38 = vmax.f32 %v460_v29, 0.0  ;;  %v502_v39 = vmax.f32 %v484_v31, 0.0  ;;  %v530_v40 = vadd.f32 %v501_v22, %v500_v17  ;;  %v518_v41 = vadd.f32 %v493_v21, %v492_v18 }
 0x113   : > { %v495_v42 = vmax.f32 %v462_v36, 0.0  ;;  %v503_v43 = vmax.f32 %v486_v37, 0.0  ;;  %v583_v44 = vadd.f32 %v566_v34, %v565_v28  ;;  %v595_v45 = vadd.f32 %v574_v35, %v573_v27  ;;  %v560_v35 = vld [vmem:[%s1414_s6 + $0x38] sm:$0xff] }
 0x114   : > { %v567_v46 = vmul.f32 %v494_v38, %v494_v38  ;;  %v575_v47 = vmul.f32 %v502_v39, %v502_v39  ;;  %590 = vadd.xlane.f32.xlu1 %v589_v5 }
 0x115   : > { %v568_v48 = vmul.f32 %v495_v42, %v495_v42  ;;  %v576_v49 = vmul.f32 %v503_v43, %v503_v43  ;;  %581 = vadd.xlane.f32.xlu0 %v580_v25  ;;  %v521_v50 = vadd.f32 %v495_v42, %v494_v38  ;;  %v533_v51 = vadd.f32 %v503_v43, %v502_v39  ;;  %v559_v25 = vld [vmem:[%s1414_s6 + $0x30] sm:$0xff] }
 0x117   : > { %v586_v52 = vadd.f32 %v568_v48, %v567_v46  ;;  %v598_v53 = vadd.f32 %v576_v49, %v575_v47 }
 0x118   : > { %516 = vadd.xlane.f32.xlu1 %v515_v20  ;;  %v507_v20 = vld [vmem:[%s1413_s5 + $0x18] sm:$0xff] }
 0x119   : > { %593 = vadd.xlane.f32.xlu0 %v592_v26  ;;  %v511_v26 = vld [vmem:[%s1413_s5 + $0x38] sm:$0xff] }
 0x11c   : > { %531 = vadd.xlane.f32.xlu1 %v530_v40 }
 0x11d   : > { %519 = vadd.xlane.f32.xlu0 %v518_v41 }
 0x120   : > { %584 = vadd.xlane.f32.xlu1 %v583_v44 }
 0x121   : > { %522 = vadd.xlane.f32.xlu0 %v521_v50 }
 0x124   : > { %596 = vadd.xlane.f32.xlu1 %v595_v45 }
 0x125   : > { %534 = vadd.xlane.f32.xlu0 %v533_v51 }
 0x129   : > { %587 = vadd.xlane.f32.xlu0 %v586_v52 }
 0x12d   : > { %599 = vadd.xlane.f32.xlu0 %v598_v53 }
 0x199   : > { %v526_v55 = vpop.xlane.xlu1 %525 }
 0x19a   : > { %v540_v56 = vadd.f32 %v526_v55, %v508_v32  ;;  %v514_v57 = vpop.xlane.xlu0 %513 }
 0x19b   : > { %v536_v58 = vadd.f32 %v514_v57, %v504_v54 }
 0x19c   : > { %549 = vst.msk [vmem:[%s1413_s5 + $0x20] sm:$0xff] %vm544_vm5, %v540_v56 }
 0x19d   : > { %545 = vst.msk [vmem:[%s1413_s5] sm:$0xff] %vm544_vm5, %v536_v58  ;;  %v579_v61 = vpop.xlane.xlu1 %578 }
 0x19e   : > { %v601_v62 = vadd.f32 %v579_v61, %v553_v59  ;;  %v529_v63 = vpop.xlane.xlu0 %528 }
 0x19f   : > { %v541_v0 = vadd.f32 %v529_v63, %v509_v60 }
 0x1a0   : > { %609 = vst.msk [vmem:[%s1414_s6] sm:$0xff] %vm544_vm5, %v601_v62 }
 0x1a1   : > { %550 = vst.msk [vmem:[%s1413_s5 + $0x28] sm:$0xff] %vm544_vm5, %v541_v0  ;;  %v591_v3 = vpop.xlane.xlu1 %590 }
 0x1a2   : > { %v605_v4 = vadd.f32 %v591_v3, %v557_v1  ;;  %v582_v5 = vpop.xlane.xlu0 %581 }
 0x1a3   : > { %v602_v6 = vadd.f32 %v582_v5, %v554_v2  ;;  %v625_v55 = vld [vmem:[%s1413_s5 + $0x20] sm:$0xff] (!%p800_p9) }
 0x1a4   : > { %613 = vst.msk [vmem:[%s1414_s6 + $0x20] sm:$0xff] %vm544_vm5, %v605_v4  ;;  %v621_v38 = vld [vmem:[%s1413_s5] sm:$0xff] (!%p800_p9)  ;;  %v1242_v59 = vmul.f32 (!%p800_p9), 0.001953125, %v625_v55 }
 0x1a5   : > { %610 = vst.msk [vmem:[%s1414_s6 + $0x8] sm:$0xff] %vm544_vm5, %v602_v6  ;;  %v517_v9 = vpop.xlane.xlu1 %516  ;;  %v1204_v40 = vmul.f32 (!%p800_p9), 0.001953125, %v621_v38 }
 0x1a6   : > { %v537_v10 = vadd.f32 %v517_v9, %v505_v7  ;;  %v594_v11 = vpop.xlane.xlu0 %593  ;;  %v657_v7 = vmul.f32 (!%p800_p9), %v1242_v59, %v1242_v59 }
 0x1a7   : > { %v606_v12 = vadd.f32 %v594_v11, %v558_v8  ;;  %v637_v39 = vld [vmem:[%s1414_s6] sm:$0xff] (!%p800_p9)  ;;  %v653_v48 = vmul.f32 (!%p800_p9), %v1204_v40, %v1204_v40 }
 0x1a8   : > { %546 = vst.msk [vmem:[%s1413_s5 + $0x8] sm:$0xff] %vm544_vm5, %v537_v10  ;;  %v645_v41 = vmul.f32 (!%p800_p9), 0.001953125, %v637_v39  ;;  %v626_v61 = vld [vmem:[%s1413_s5 + $0x28] sm:$0xff] (!%p800_p9)  ;;  %v689_v39 = vld [vmem:[%s1411_s3 + $0x20] sm:$0xff] (!%p800_p9) }
 0x1a9   : > { %614 = vst.msk [vmem:[%s1414_s6 + $0x28] sm:$0xff] %vm544_vm5, %v606_v12  ;;  %v532_v15 = vpop.xlane.xlu1 %531  ;;  %v1252_v1 = vmul.f32 (!%p800_p9), 0.001953125, %v626_v61 }
 0x1aa   : > { %v542_v16 = vadd.f32 %v532_v15, %v510_v13  ;;  %v520_v17 = vpop.xlane.xlu0 %519  ;;  %v661_v57 = vsub.f32 (!%p800_p9), %v645_v41, %v653_v48  ;;  %v709_v41 = vld [vmem:[%s1412_s4] sm:$0xff] (!%p800_p9) }
 0x1ab   : > { %v538_v18 = vadd.f32 %v520_v17, %v506_v14  ;;  %v641_v56 = vld [vmem:[%s1414_s6 + $0x20] sm:$0xff] (!%p800_p9)  ;;  %v658_v12 = vmul.f32 (!%p800_p9), %v1252_v1, %v1252_v1 }
 0x1ac   : > { %551 = vst.msk [vmem:[%s1413_s5 + $0x30] sm:$0xff] %vm544_vm5, %v542_v16  ;;  %v638_v43 = vld [vmem:[%s1414_s6 + $0x8] sm:$0xff] (!%p800_p9)  ;;  %v649_v60 = vmul.f32 (!%p800_p9), 0.001953125, %v641_v56  ;;  %v669_v5 = vadd.f32 (!%p800_p9), 0.001, %v661_v57  ;;  %v712_v57 = vld [vmem:[%s1412_s4 + $0x18] sm:$0xff] (!%p800_p9) }
 0x1ad   : > { %547 = vst.msk [vmem:[%s1413_s5 + $0x10] sm:$0xff] %vm544_vm5, %v538_v18  ;;  %v585_v21 = vpop.xlane.xlu1 %584  ;;  %v646_v45 = vmul.f32 (!%p800_p9), 0.001953125, %v638_v43 }
 0x1ae   : > { %v603_v22 = vadd.f32 %v585_v21, %v555_v19  ;;  %v523_v23 = vpop.xlane.xlu0 %522  ;;  %842 = vrsqrt.f32 (!%p800_p9), %v669_v5  ;;  %v665_v16 = vsub.f32 (!%p800_p9), %v649_v60, %v657_v7 }
 0x1af   : > { %v539_v24 = vadd.f32 %v523_v23, %v507_v20  ;;  %v622_v42 = vld [vmem:[%s1413_s5 + $0x8] sm:$0xff] (!%p800_p9) }
 0x1b0   : > { %611 = vst.msk [vmem:[%s1414_s6 + $0x10] sm:$0xff] %vm544_vm5, %v603_v22  ;;  %v1212_v44 = vmul.f32 (!%p800_p9), 0.001953125, %v622_v42  ;;  %v642_v62 = vld [vmem:[%s1414_s6 + $0x28] sm:$0xff] (!%p800_p9)  ;;  %v673_v21 = vadd.f32 (!%p800_p9), 0.001, %v665_v16 }
 0x1b1   : > { %548 = vst.msk [vmem:[%s1413_s5 + $0x18] sm:$0xff] %vm544_vm5, %v539_v24  ;;  %v597_v27 = vpop.xlane.xlu1 %596  ;;  %v650_v2 = vmul.f32 (!%p800_p9), 0.001953125, %v642_v62  ;;  %v713_v62 = vld [vmem:[%s1412_s4 + $0x20] sm:$0xff] (!%p800_p9) }
 0x1b2   : > { %v607_v28 = vadd.f32 %v597_v27, %v559_v25  ;;  %v535_v29 = vpop.xlane.xlu0 %534  ;;  %v654_v53 = vmul.f32 (!%p800_p9), %v1212_v44, %v1212_v44 }
 0x1b3   : > { %v543_v31 = vadd.f32 %v535_v29, %v511_v26  ;;  %v627_v3 = vld [vmem:[%s1413_s5 + $0x30] sm:$0xff] (!%p800_p9)  ;;  %v666_v19 = vsub.f32 (!%p800_p9), %v650_v2, %v658_v12  ;;  %v685_v29 = vld [vmem:[%s1411_s3] sm:$0xff] (!%p800_p9)  ;;  %v714_v2 = vld [vmem:[%s1412_s4 + $0x28] sm:$0xff] (!%p800_p9) }
 0x1b4   : > { %615 = vst.msk [vmem:[%s1414_s6 + $0x30] sm:$0xff] %vm544_vm5, %v607_v28  ;;  %v623_v46 = vld [vmem:[%s1413_s5 + $0x10] sm:$0xff] (!%p800_p9)  ;;  %v662_v63 = vsub.f32 (!%p800_p9), %v646_v45, %v654_v53  ;;  %v1262_v8 = vmul.f32 (!%p800_p9), 0.001953125, %v627_v3  ;;  %v690_v45 = vld [vmem:[%s1411_s3 + $0x28] sm:$0xff] (!%p800_p9) }
 0x1b5   : > { %552 = vst.msk [vmem:[%s1413_s5 + $0x38] sm:$0xff] %vm544_vm5, %v543_v31  ;;  %v1222_v49 = vmul.f32 (!%p800_p9), 0.001953125, %v623_v46  ;;  %v674_v24 = vadd.f32 (!%p800_p9), 0.001, %v666_v19  ;;  %v686_v31 = vld [vmem:[%s1411_s3 + $0x8] sm:$0xff] (!%p800_p9) }
 0x1b6   : > { %v588_v30 = vpop.xlane.xlu0 %587  ;;  %v670_v10 = vadd.f32 (!%p800_p9), 0.001, %v662_v63  ;;  %v659_v17 = vmul.f32 (!%p800_p9), %v1262_v8, %v1262_v8  ;;  %v692_v63 = vld [vmem:[%s1411_s3 + $0x38] sm:$0xff] (!%p800_p9) }
 0x1b7   : > { %v604_v34 = vadd.f32 %v588_v30, %v556_v33  ;;  %620 = sbr.rel (%p800_p9) target bundleno = 477 (0x1dd), region = 71  ;;  %v639_v47 = vld [vmem:[%s1414_s6 + $0x10] sm:$0xff] (!%p800_p9)  ;;  %v655_v58 = vmul.f32 (!%p800_p9), %v1222_v49, %v1222_v49 }
 0x1b8   : > { %v647_v50 = vmul.f32 (!%p800_p9), 0.001953125, %v639_v47  ;;  %v624_v51 = vld [vmem:[%s1413_s5 + $0x18] sm:$0xff] (!%p800_p9)  ;;  %844 = vrsqrt.f32 (!%p800_p9), %v670_v10  ;;  %v843_v33 = vpop.eup (!%p800_p9), %842  ;;  %v687_v30 = vld [vmem:[%s1411_s3 + $0x10] sm:$0xff] (!%p800_p9)  ;;  %v710_v47 = vld [vmem:[%s1412_s4 + $0x8] sm:$0xff] (!%p800_p9) }
 0x1b9   : > { %612 = vst.msk [vmem:[%s1414_s6 + $0x18] sm:$0xff] %vm544_vm5, %v604_v34  ;;  %v1232_v32 = vmul.f32 (!%p800_p9), 0.001953125, %v624_v51  ;;  %v691_v51 = vld [vmem:[%s1411_s3 + $0x30] sm:$0xff] (!%p800_p9) }
 0x1ba   : > { %v600_v36 = vpop.xlane.xlu0 %599  ;;  %v663_v6 = vsub.f32 (!%p800_p9), %v647_v50, %v655_v58 }
 0x1bb   : > { %v608_v37 = vadd.f32 %v600_v36, %v560_v35  ;;  %v656_v0 = vmul.f32 (!%p800_p9), %v1232_v32, %v1232_v32  ;;  %v643_v4 = vld [vmem:[%s1414_s6 + $0x30] sm:$0xff] (!%p800_p9)  ;;  %v693_v35 = vmul.f32 (!%p800_p9), %v843_v33, %v685_v29  ;;  %v688_v36 = vld [vmem:[%s1411_s3 + $0x18] sm:$0xff] (!%p800_p9) }
 0x1bc   : > { %v628_v9 = vld [vmem:[%s1413_s5 + $0x38] sm:$0xff] (!%p800_p9)  ;;  %v651_v13 = vmul.f32 (!%p800_p9), 0.001953125, %v643_v4  ;;  %v671_v15 = vadd.f32 (!%p800_p9), 0.001, %v663_v6 }
 0x1bd   : > { %616 = vst.msk [vmem:[%s1414_s6 + $0x38] sm:$0xff] %vm544_vm5, %v608_v37  ;;  %v1274_v20 = vmul.f32 (!%p800_p9), 0.001953125, %v628_v9  ;;  %701 = vst.msk [vmem:[%s1413_s5] sm:$0xff] (!%p800_p9), %vm544_vm5, %v693_v35  ;;  %v717_v46 = vmul.f32 (!%p800_p9), %v693_v35, %v1204_v40  ;;  %v711_v40 = vld [vmem:[%s1412_s4 + $0x10] sm:$0xff] (!%p800_p9) }
 0x1be   : > { %846 = vrsqrt.f32 %v671_v15  ;;  %v667_v22 = vsub.f32 %v651_v13, %v659_v17 }
 0x1bf   : > { %v660_v25 = vmul.f32 %v1274_v20, %v1274_v20  ;;  %v725_v55 = vsub.f32 %v709_v41, %v717_v46 }
 0x1c0   : > { %v640_v52 = vld [vmem:[%s1414_s6 + $0x18] sm:$0xff]  ;;  %v675_v26 = vadd.f32 0.001, %v667_v22 }
 0x1c1   : > { %v648_v54 = vmul.f32 0.001953125, %v640_v52  ;;  %733 = vst.msk [vmem:[%s1414_s6] sm:$0xff] %vm544_vm5, %v725_v55 }
 0x1c2   : > { %v845_v34 = vpop.eup %844 }
 0x1c3   : > { %v664_v11 = vsub.f32 %v648_v54, %v656_v0  ;;  %v694_v38 = vmul.f32 %v845_v34, %v686_v31 }
 0x1c4   : > { %v644_v14 = vld [vmem:[%s1414_s6 + $0x38] sm:$0xff] }
 0x1c5   : > { %v672_v18 = vadd.f32 0.001, %v664_v11  ;;  %v652_v23 = vmul.f32 0.001953125, %v644_v14  ;;  %702 = vst.msk [vmem:[%s1413_s5 + $0x8] sm:$0xff] %vm544_vm5, %v694_v38  ;;  %v718_v52 = vmul.f32 %v694_v38, %v1212_v44  ;;  %v716_v11 = vld [vmem:[%s1412_s4 + $0x38] sm:$0xff] }
 0x1c7   : > { %848 = vrsqrt.f32 %v672_v18  ;;  %v668_v27 = vsub.f32 %v652_v23, %v660_v25  ;;  %v726_v60 = vsub.f32 %v710_v47, %v718_v52 }
 0x1c8   : > { %850 = vrsqrt.f32 %v673_v21  ;;  %v847_v37 = vpop.eup %846 }
 0x1c9   : > { %852 = vrsqrt.f32 %v674_v24  ;;  %v676_v28 = vadd.f32 0.001, %v668_v27  ;;  %v695_v43 = vmul.f32 %v847_v37, %v687_v30  ;;  %734 = vst.msk [vmem:[%s1414_s6 + $0x8] sm:$0xff] %vm544_vm5, %v726_v60 }
 0x1ca   : > { %854 = vrsqrt.f32 %v675_v26 }
 0x1cb   : > { %856 = vrsqrt.f32 %v676_v28  ;;  %703 = vst.msk [vmem:[%s1413_s5 + $0x10] sm:$0xff] %vm544_vm5, %v695_v43  ;;  %v719_v56 = vmul.f32 %v695_v43, %v1222_v49 }
 0x1d1   : > { %v849_v42 = vpop.eup %848 }
 0x1d2   : > { %v851_v48 = vpop.eup %850  ;;  %v696_v50 = vmul.f32 %v849_v42, %v688_v36 }
 0x1d3   : > { %v853_v53 = vpop.eup %852  ;;  %v697_v54 = vmul.f32 %v851_v48, %v689_v39 }
 0x1d4   : > { %v855_v58 = vpop.eup %854  ;;  %704 = vst.msk [vmem:[%s1413_s5 + $0x18] sm:$0xff] %vm544_vm5, %v696_v50  ;;  %v698_v44 = vmul.f32 %v853_v53, %v690_v45  ;;  %v720_v61 = vmul.f32 %v696_v50, %v1232_v32  ;;  %v727_v32 = vsub.f32 %v711_v40, %v719_v56 }
 0x1d5   : > { %705 = vst.msk [vmem:[%s1413_s5 + $0x20] sm:$0xff] %vm544_vm5, %v697_v54  ;;  %v699_v49 = vmul.f32 %v855_v58, %v691_v51  ;;  %v721_v0 = vmul.f32 %v697_v54, %v1242_v59  ;;  %v715_v59 = vld [vmem:[%s1412_s4 + $0x30] sm:$0xff]  ;;  %v857_v5 = vpop.eup %856 }
 0x1d6   : > { %706 = vst.msk [vmem:[%s1413_s5 + $0x28] sm:$0xff] %vm544_vm5, %v698_v44  ;;  %v728_v3 = vsub.f32 %v712_v57, %v720_v61  ;;  %v722_v4 = vmul.f32 %v698_v44, %v1252_v1  ;;  %735 = vst.msk [vmem:[%s1414_s6 + $0x10] sm:$0xff] %vm544_vm5, %v727_v32  ;;  %v700_v9 = vmul.f32 %v857_v5, %v692_v63 }
 0x1d7   : > { %707 = vst.msk [vmem:[%s1413_s5 + $0x30] sm:$0xff] %vm544_vm5, %v699_v49  ;;  %v729_v6 = vsub.f32 %v713_v62, %v721_v0  ;;  %v723_v7 = vmul.f32 %v699_v49, %v1262_v8 }
 0x1d8   : > { %736 = vst.msk [vmem:[%s1414_s6 + $0x18] sm:$0xff] %vm544_vm5, %v728_v3  ;;  %v730_v1 = vsub.f32 %v714_v2, %v722_v4  ;;  %708 = vst.msk [vmem:[%s1413_s5 + $0x38] sm:$0xff] %vm544_vm5, %v700_v9  ;;  %v724_v8 = vmul.f32 %v700_v9, %v1274_v20 }
 0x1d9   : > { %737 = vst.msk [vmem:[%s1414_s6 + $0x20] sm:$0xff] %vm544_vm5, %v729_v6  ;;  %v731_v10 = vsub.f32 %v715_v59, %v723_v7 }
 0x1da   : > { %738 = vst.msk [vmem:[%s1414_s6 + $0x28] sm:$0xff] %vm544_vm5, %v730_v1  ;;  %v732_v12 = vsub.f32 %v716_v11, %v724_v8 }
 0x1db   : > { %739 = vst.msk [vmem:[%s1414_s6 + $0x30] sm:$0xff] %vm544_vm5, %v731_v10 }
 0x1dc   : > { %740 = vst.msk [vmem:[%s1414_s6 + $0x38] sm:$0xff] %vm544_vm5, %v732_v12 }
 0x1dd PF: > { %p14_p10 = scmp.ge.s32.totalorder %s938_s25, 4   ;;  %s1415_s21 = smov %s876_s22 }
 0x1de   : > { %s1416_s22 = smov %s947_s28  ;;  %s1417_s23 = smov %s938_s25 }
 0x1df   :  { %16 = sbr.rel (!%p14_p10) target bundleno = 2 (0x2), region = 110 }

</bundles_post_ra>
